<compile_context>
chip_gen: v5e
topology: v5e:2x2
jax: 0.10.0
libtpu: 0.0.40
codegen_flags: <defaults>
</compile_context>

<pallas_src>
import functools

import jax
import jax.numpy as jnp
from jax.experimental import pallas as pl
from jax.experimental.pallas import tpu as pltpu


def _bottleneck_kernel(x_ref, w1_ref, t1_ref, w2_ref, t2_ref, w3_ref, t3_ref,
                       o_ref, k_scratch):
    """Fused bottleneck block for one batch element, NCL layout.

    x_ref : (1, Cin, L)  input slab (channels in sublanes, L in lanes)
    w1    : (H, Cin)     1x1 conv weights, BN scale pre-folded
    w2    : (H, 3H)      k=3 conv, the 3 taps stacked along K: [x[l-1], x[l], x[l+1]]
    w3    : (Cin, H)     1x1 conv weights, BN scale pre-folded
    t1/t2/t3 : (C, 1)    per-channel shift (conv bias + BN folded), f32
    k_scratch: (3H, L)   VMEM scratch holding the stacked shifted activations
    """
    cdt = w1_ref.dtype                                   # compute dtype (f32 / bf16)
    x = x_ref[0]                                         # (Cin, L)
    x_f32 = x.astype(jnp.float32)

    # --- block 1: 1x1 conv (BN scale folded) + shift + ReLU -> (H, L) f32 ---
    h1 = jnp.dot(w1_ref[...], x, preferred_element_type=jnp.float32)
    h1 = jnp.maximum(h1 + t1_ref[...], 0.0)

    # --- block 2: k=3 'same' conv as ONE matmul with K = 3H ---
    H, L = h1.shape
    lane = jax.lax.broadcasted_iota(jnp.int32, (H, L), 1)
    # x[l-1] / x[l+1] via lane rotation (XLU) + zero the wrapped boundary column.
    prev = jnp.where(lane == 0, 0.0, pltpu.roll(h1, 1, axis=1))
    nxt = jnp.where(lane == L - 1, 0.0, pltpu.roll(h1, L - 1, axis=1))
    k_scratch[0:H, :] = prev.astype(cdt)
    k_scratch[H:2 * H, :] = h1.astype(cdt)
    k_scratch[2 * H:3 * H, :] = nxt.astype(cdt)

    h2 = jnp.dot(w2_ref[...], k_scratch[...], preferred_element_type=jnp.float32)
    h2 = jnp.maximum(h2 + t2_ref[...], 0.0)              # (H, L) f32

    # --- block 3: 1x1 conv + BN shift (no activation) ---
    h3 = jnp.dot(w3_ref[...], h2.astype(cdt), preferred_element_type=jnp.float32)
    h3 = h3 + t3_ref[...]                                # (Cin, L) f32

    # --- residual + ReLU (f32 epilogue) ---
    o_ref[0] = jnp.maximum(h3 + x_f32, 0.0).astype(o_ref.dtype)


def _fold_bn(bias, gamma, beta, mean, var, eps=1e-5):
    """Fold conv bias + eval-mode BatchNorm into per-channel scale/shift."""
    scale = gamma / jnp.sqrt(var + eps)
    shift = (bias - mean) * scale + beta
    return scale, shift


@functools.partial(jax.jit, static_argnames=("compute_dtype",))
def bottleneck_block(x_ncl, params, *, compute_dtype=jnp.float32):
    """x_ncl: (N, Cin, L) float32, PyTorch NCL layout (kept as-is, no transpose)."""
    (w1, b1, bn1), (w2, b2, bn2), (w3, b3, bn3) = params
    N, Cin, L = x_ncl.shape
    H = w1.shape[0]

    s1, t1 = _fold_bn(b1, *bn1)
    s2, t2 = _fold_bn(b2, *bn2)
    s3, t3 = _fold_bn(b3, *bn3)

    # Fold BN scale into the conv weights (zero runtime cost in the kernel).
    w1k = (w1[:, :, 0] * s1[:, None]).astype(compute_dtype)          # (H, Cin)
    # Stack the 3 taps along K in the order matching the kernel scratch:
    # columns [0:H) -> x[l-1], [H:2H) -> x[l], [2H:3H) -> x[l+1].
    w2k = (jnp.concatenate([w2[:, :, 0], w2[:, :, 1], w2[:, :, 2]], axis=1)
           * s2[:, None]).astype(compute_dtype)                      # (H, 3H)
    w3k = (w3[:, :, 0] * s3[:, None]).astype(compute_dtype)          # (Cin, H)

    t1 = t1.reshape(H, 1).astype(jnp.float32)
    t2 = t2.reshape(H, 1).astype(jnp.float32)
    t3 = t3.reshape(Cin, 1).astype(jnp.float32)

    x = x_ncl.astype(compute_dtype)                                  # NCL, no transpose

    full = lambda shape: pl.BlockSpec(shape, lambda n: (0,) * len(shape))

    out = pl.pallas_call(
        _bottleneck_kernel,
        out_shape=jax.ShapeDtypeStruct((N, Cin, L), jnp.float32),
        grid_spec=pltpu.PrefetchScalarGridSpec(
            num_scalar_prefetch=0,
            grid=(N,),
            in_specs=[
                pl.BlockSpec((1, Cin, L), lambda n: (n, 0, 0)),      # x
                full((H, Cin)), full((H, 1)),                        # w1, t1
                full((H, 3 * H)), full((H, 1)),                      # w2 (fused taps), t2
                full((Cin, H)), full((Cin, 1)),                      # w3, t3
            ],
            out_specs=pl.BlockSpec((1, Cin, L), lambda n: (n, 0, 0)),
            scratch_shapes=[pltpu.VMEM((3 * H, L), compute_dtype)],
        ),
        compiler_params=pltpu.CompilerParams(
            dimension_semantics=("parallel",)),
    )(x, w1k, t1, w2k, t2, w3k, t3)

    return out


# ---------------------------------------------------------------------------
# Pure-JAX reference (lax.conv) for correctness checking.
# ---------------------------------------------------------------------------
def _conv_bn(x, w, b, bn, eps=1e-5):
    gamma, beta, mean, var = bn
    pad = (w.shape[2] - 1) // 2
    y = jax.lax.conv_general_dilated(
        x, w, window_strides=(1,), padding=[(pad, pad)],
        dimension_numbers=('NCH', 'OIH', 'NCH'))
    y = y + b[None, :, None]
    scale = gamma / jnp.sqrt(var + eps)
    return (y - mean[None, :, None]) * scale[None, :, None] + beta[None, :, None]


def bottleneck_reference(x, params):
    (w1, b1, bn1), (w2, b2, bn2), (w3, b3, bn3) = params
    h = jax.nn.relu(_conv_bn(x, w1, b1, bn1))
    h = jax.nn.relu(_conv_bn(h, w2, b2, bn2))
    h = _conv_bn(h, w3, b3, bn3)
    return jax.nn.relu(h + x)


def _init_params(key, input_dim, hidden_dim):
    ks = jax.random.split(key, 12)

    def conv_params(kw, kb, out_c, in_c, ksz):
        w = 0.2 * jax.random.normal(kw, (out_c, in_c, ksz), jnp.float32)
        b = 0.1 * jax.random.normal(kb, (out_c,), jnp.float32)
        return w, b

    def bn_params(kg, kb2, c):
        gamma = 1.0 + 0.1 * jax.random.normal(kg, (c,), jnp.float32)
        beta = 0.05 * jax.random.normal(kb2, (c,), jnp.float32)
        mean = 0.02 * jnp.arange(c, dtype=jnp.float32)
        var = 1.0 + 0.01 * jnp.arange(c, dtype=jnp.float32)
        return (gamma, beta, mean, var)

    w1, b1 = conv_params(ks[0], ks[1], hidden_dim, input_dim, 1)
    w2, b2 = conv_params(ks[2], ks[3], hidden_dim, hidden_dim, 3)
    w3, b3 = conv_params(ks[4], ks[5], input_dim, hidden_dim, 1)
    bn1 = bn_params(ks[6], ks[7], hidden_dim)
    bn2 = bn_params(ks[8], ks[9], hidden_dim)
    bn3 = bn_params(ks[10], ks[11], input_dim)
    return ((w1, b1, bn1), (w2, b2, bn2), (w3, b3, bn3))


if __name__ == "__main__":
    key = jax.random.PRNGKey(0)
    k_x, k_p = jax.random.split(key)

    N, C_IN, L, HID = 2, 8, 16, 32
    x = jax.random.normal(k_x, (N, C_IN, L), jnp.float32)   # PyTorch NCL input
    params = _init_params(k_p, C_IN, HID)

    y_ref = bottleneck_reference(x, params)

    # f32 path (default; exact match vs reference)
    y = bottleneck_block(x, params)
    y = jax.block_until_ready(y)
    assert y.shape == (N, C_IN, L)
    assert jnp.allclose(y, y_ref, atol=1e-4, rtol=1e-4), "f32 mismatch vs reference"

    # bf16 MXU path (v6e/v7x rate; f32 accumulation + f32 epilogue)
    y_bf16 = bottleneck_block(x, params, compute_dtype=jnp.bfloat16)
    y_bf16 = jax.block_until_ready(y_bf16)
    assert jnp.allclose(y_bf16, y_ref, atol=1e-1, rtol=1e-1), "bf16 mismatch vs reference"

    print("KERNEL_OK")
</pallas_src>

<mosaic_0001>
module attributes {stable_mosaic.version = 11 : i64} {
  func.func @_bottleneck_kernel(%arg0: i32, %arg1: memref<1x8x16xf32, #tpu.memory_space<vmem>>, %arg2: memref<32x8xf32, #tpu.memory_space<vmem>>, %arg3: memref<32x1xf32, #tpu.memory_space<vmem>>, %arg4: memref<32x96xf32, #tpu.memory_space<vmem>>, %arg5: memref<32x1xf32, #tpu.memory_space<vmem>>, %arg6: memref<8x32xf32, #tpu.memory_space<vmem>>, %arg7: memref<8x1xf32, #tpu.memory_space<vmem>>, %arg8: memref<1x8x16xf32, #tpu.memory_space<vmem>>, %arg9: memref<96x16xf32, #tpu.memory_space<vmem>>) attributes {dimension_semantics = [#tpu.dimension_semantics<parallel>], iteration_bounds = array<i64: 2>, scalar_prefetch = 0 : i64, scratch_operands = 1 : i64, tpu.core_type = #tpu.core_type<tc>, window_params = [{transform_indices = @transform_0, window_bounds = array<i64: 1, 8, 16>}, {pipeline_mode = #tpu.pipeline_mode<synchronous>, transform_indices = @transform_1, window_bounds = array<i64: 32, 8>}, {pipeline_mode = #tpu.pipeline_mode<synchronous>, transform_indices = @transform_2, window_bounds = array<i64: 32, 1>}, {pipeline_mode = #tpu.pipeline_mode<synchronous>, transform_indices = @transform_3, window_bounds = array<i64: 32, 96>}, {pipeline_mode = #tpu.pipeline_mode<synchronous>, transform_indices = @transform_4, window_bounds = array<i64: 32, 1>}, {pipeline_mode = #tpu.pipeline_mode<synchronous>, transform_indices = @transform_5, window_bounds = array<i64: 8, 32>}, {pipeline_mode = #tpu.pipeline_mode<synchronous>, transform_indices = @transform_6, window_bounds = array<i64: 8, 1>}, {transform_indices = @transform_7, window_bounds = array<i64: 1, 8, 16>}]} {
    %c0 = arith.constant 0 : index
    %c0_0 = arith.constant 0 : index
    %c0_1 = arith.constant 0 : index
    %0 = vector.load %arg1[%c0, %c0_0, %c0_1] : memref<1x8x16xf32, #tpu.memory_space<vmem>>, vector<1x8x16xf32>
    %1 = vector.shape_cast %0 : vector<1x8x16xf32> to vector<8x16xf32>
    %c0_2 = arith.constant 0 : index
    %c0_3 = arith.constant 0 : index
    %2 = vector.load %arg2[%c0_2, %c0_3] : memref<32x8xf32, #tpu.memory_space<vmem>>, vector<32x8xf32>
    %cst = arith.constant dense<0.000000e+00> : vector<32x16xf32>
    %3 = tpu.matmul %2, %1, %cst {dimension_numbers = #tpu.dot_dimension_numbers<[1], [0], [0], [1], [0, 0, 1, 1], [], []>} : vector<32x8xf32>, vector<8x16xf32>, vector<32x16xf32> -> vector<32x16xf32>
    %c0_4 = arith.constant 0 : index
    %c0_5 = arith.constant 0 : index
    %4 = vector.load %arg3[%c0_4, %c0_5] : memref<32x1xf32, #tpu.memory_space<vmem>>, vector<32x1xf32>
    %5 = vector.broadcast %4 : vector<32x1xf32> to vector<32x16xf32>
    %6 = arith.addf %3, %5 : vector<32x16xf32>
    %cst_6 = arith.constant 0.000000e+00 : f32
    %7 = vector.broadcast %cst_6 : f32 to vector<32x16xf32>
    %8 = arith.maximumf %6, %7 : vector<32x16xf32>
    %9 = tpu.iota {dimensions = array<i32: 1>} : vector<32x16xi32>
    %c0_i32 = arith.constant 0 : i32
    %10 = vector.broadcast %c0_i32 : i32 to vector<32x16xi32>
    %11 = arith.cmpi eq, %9, %10 : vector<32x16xi32>
    %c1_i32 = arith.constant 1 : i32
    %12 = tpu.dynamic_rotate %8 by %c1_i32 dim 1 : vector<32x16xf32>, i32 -> vector<32x16xf32>
    %cst_7 = arith.constant 0.000000e+00 : f32
    %13 = vector.broadcast %cst_7 : f32 to vector<32x16xf32>
    %14 = arith.select %11, %13, %12 : vector<32x16xi1>, vector<32x16xf32>
    %c15_i32 = arith.constant 15 : i32
    %15 = vector.broadcast %c15_i32 : i32 to vector<32x16xi32>
    %16 = arith.cmpi eq, %9, %15 : vector<32x16xi32>
    %c15_i32_8 = arith.constant 15 : i32
    %17 = tpu.dynamic_rotate %8 by %c15_i32_8 dim 1 : vector<32x16xf32>, i32 -> vector<32x16xf32>
    %cst_9 = arith.constant 0.000000e+00 : f32
    %18 = vector.broadcast %cst_9 : f32 to vector<32x16xf32>
    %19 = arith.select %16, %18, %17 : vector<32x16xi1>, vector<32x16xf32>
    %c0_10 = arith.constant 0 : index
    %c0_11 = arith.constant 0 : index
    %20 = vector.load %arg9[%c0_10, %c0_11] : memref<96x16xf32, #tpu.memory_space<vmem>>, vector<32x16xf32>
    tpu.vector_store %arg9[%c0_10, %c0_11], %14 {strides = array<i32>} : memref<96x16xf32, #tpu.memory_space<vmem>>, vector<32x16xf32>,
    %c32 = arith.constant 32 : index
    %c0_12 = arith.constant 0 : index
    %21 = vector.load %arg9[%c32, %c0_12] : memref<96x16xf32, #tpu.memory_space<vmem>>, vector<32x16xf32>
    tpu.vector_store %arg9[%c32, %c0_12], %8 {strides = array<i32>} : memref<96x16xf32, #tpu.memory_space<vmem>>, vector<32x16xf32>,
    %c64 = arith.constant 64 : index
    %c0_13 = arith.constant 0 : index
    %22 = vector.load %arg9[%c64, %c0_13] : memref<96x16xf32, #tpu.memory_space<vmem>>, vector<32x16xf32>
    tpu.vector_store %arg9[%c64, %c0_13], %19 {strides = array<i32>} : memref<96x16xf32, #tpu.memory_space<vmem>>, vector<32x16xf32>,
    %c0_14 = arith.constant 0 : index
    %c0_15 = arith.constant 0 : index
    %23 = vector.load %arg4[%c0_14, %c0_15] : memref<32x96xf32, #tpu.memory_space<vmem>>, vector<32x96xf32>
    %c0_16 = arith.constant 0 : index
    %c0_17 = arith.constant 0 : index
    %24 = vector.load %arg9[%c0_16, %c0_17] : memref<96x16xf32, #tpu.memory_space<vmem>>, vector<96x16xf32>
    %cst_18 = arith.constant dense<0.000000e+00> : vector<32x16xf32>
    %25 = tpu.matmul %23, %24, %cst_18 {dimension_numbers = #tpu.dot_dimension_numbers<[1], [0], [0], [1], [0, 0, 1, 1], [], []>} : vector<32x96xf32>, vector<96x16xf32>, vector<32x16xf32> -> vector<32x16xf32>
    %c0_19 = arith.constant 0 : index
    %c0_20 = arith.constant 0 : index
    %26 = vector.load %arg5[%c0_19, %c0_20] : memref<32x1xf32, #tpu.memory_space<vmem>>, vector<32x1xf32>
    %27 = vector.broadcast %26 : vector<32x1xf32> to vector<32x16xf32>
    %28 = arith.addf %25, %27 : vector<32x16xf32>
    %cst_21 = arith.constant 0.000000e+00 : f32
    %29 = vector.broadcast %cst_21 : f32 to vector<32x16xf32>
    %30 = arith.maximumf %28, %29 : vector<32x16xf32>
    %c0_22 = arith.constant 0 : index
    %c0_23 = arith.constant 0 : index
    %31 = vector.load %arg6[%c0_22, %c0_23] : memref<8x32xf32, #tpu.memory_space<vmem>>, vector<8x32xf32>
    %cst_24 = arith.constant dense<0.000000e+00> : vector<8x16xf32>
    %32 = tpu.matmul %31, %30, %cst_24 {dimension_numbers = #tpu.dot_dimension_numbers<[1], [0], [0], [1], [0, 0, 1, 1], [], []>} : vector<8x32xf32>, vector<32x16xf32>, vector<8x16xf32> -> vector<8x16xf32>
    %c0_25 = arith.constant 0 : index
    %c0_26 = arith.constant 0 : index
    %33 = vector.load %arg7[%c0_25, %c0_26] : memref<8x1xf32, #tpu.memory_space<vmem>>, vector<8x1xf32>
    %34 = vector.broadcast %33 : vector<8x1xf32> to vector<8x16xf32>
    %35 = arith.addf %32, %34 : vector<8x16xf32>
    %36 = arith.addf %35, %1 : vector<8x16xf32>
    %cst_27 = arith.constant 0.000000e+00 : f32
    %37 = vector.broadcast %cst_27 : f32 to vector<8x16xf32>
    %38 = arith.maximumf %36, %37 : vector<8x16xf32>
    %c0_28 = arith.constant 0 : index
    %c0_29 = arith.constant 0 : index
    %c0_30 = arith.constant 0 : index
    %39 = vector.load %arg8[%c0_28, %c0_29, %c0_30] : memref<1x8x16xf32, #tpu.memory_space<vmem>>, vector<1x8x16xf32>
    %40 = vector.shape_cast %39 : vector<1x8x16xf32> to vector<8x16xf32>
    %41 = vector.shape_cast %38 : vector<8x16xf32> to vector<1x8x16xf32>
    tpu.vector_store %arg8[%c0_28, %c0_29, %c0_30], %41 {strides = array<i32>} : memref<1x8x16xf32, #tpu.memory_space<vmem>>, vector<1x8x16xf32>,
    return
  }
  func.func @transform_0(%arg0: i32) -> (i32, i32, i32) {
    %c0_i32 = arith.constant 0 : i32
    %c0_i32_0 = arith.constant 0 : i32
    %c0_i32_1 = arith.constant 0 : i32
    return %arg0, %c0_i32, %c0_i32_0 : i32, i32, i32
  }
  func.func @transform_1(%arg0: i32) -> (i32, i32) {
    %c0_i32 = arith.constant 0 : i32
    %c0_i32_0 = arith.constant 0 : i32
    %c0_i32_1 = arith.constant 0 : i32
    return %c0_i32, %c0_i32_0 : i32, i32
  }
  func.func @transform_2(%arg0: i32) -> (i32, i32) {
    %c0_i32 = arith.constant 0 : i32
    %c0_i32_0 = arith.constant 0 : i32
    %c0_i32_1 = arith.constant 0 : i32
    return %c0_i32, %c0_i32_0 : i32, i32
  }
  func.func @transform_3(%arg0: i32) -> (i32, i32) {
    %c0_i32 = arith.constant 0 : i32
    %c0_i32_0 = arith.constant 0 : i32
    %c0_i32_1 = arith.constant 0 : i32
    return %c0_i32, %c0_i32_0 : i32, i32
  }
  func.func @transform_4(%arg0: i32) -> (i32, i32) {
    %c0_i32 = arith.constant 0 : i32
    %c0_i32_0 = arith.constant 0 : i32
    %c0_i32_1 = arith.constant 0 : i32
    return %c0_i32, %c0_i32_0 : i32, i32
  }
  func.func @transform_5(%arg0: i32) -> (i32, i32) {
    %c0_i32 = arith.constant 0 : i32
    %c0_i32_0 = arith.constant 0 : i32
    %c0_i32_1 = arith.constant 0 : i32
    return %c0_i32, %c0_i32_0 : i32, i32
  }
  func.func @transform_6(%arg0: i32) -> (i32, i32) {
    %c0_i32 = arith.constant 0 : i32
    %c0_i32_0 = arith.constant 0 : i32
    %c0_i32_1 = arith.constant 0 : i32
    return %c0_i32, %c0_i32_0 : i32, i32
  }
  func.func @transform_7(%arg0: i32) -> (i32, i32, i32) {
    %c0_i32 = arith.constant 0 : i32
    %c0_i32_0 = arith.constant 0 : i32
    %c0_i32_1 = arith.constant 0 : i32
    return %arg0, %c0_i32, %c0_i32_0 : i32, i32, i32
  }
}

</mosaic_0001>

<bundles_post_ra>
// kernel: bottleneck_block.1
= control target key start
LH: loop header
LB: loop body
LE: loop exit
PB: predicated region body
PF: predicated region fallthrough
CT: control target
= control target key end

     0   :  { %12 = vsyncpa [#allocation4], 0  ;;  %s991_s0 = inlined_call_operand.vmem [shape: f32[2,8,16], index: 0, kind: input, shape index: {}]   ;;  %s992_s1 = inlined_call_operand.vmem [shape: f32[32,8], index: 1, kind: input, shape index: {}]   ;;  %s993_s2 = inlined_call_operand.vmem [shape: f32[32,1], index: 2, kind: input, shape index: {}]   ;;  %s994_s3 = inlined_call_operand.vmem [shape: f32[32,96], index: 3, kind: input, shape index: {}]   ;;  %s995_s4 = inlined_call_operand.vmem [shape: f32[32,1], index: 4, kind: input, shape index: {}]   ;;  %s996_s5 = inlined_call_operand.vmem [shape: f32[8,32], index: 5, kind: input, shape index: {}]   ;;  %s997_s6 = inlined_call_operand.vmem [shape: f32[8,1], index: 6, kind: input, shape index: {}]   ;;  %s998_s7 = inlined_call_operand.hbm [shape: f32[2,8,16], index: 7, kind: output, shape index: {}]  }
   0x1   :  { %14 = vsyncpa [#allocation4 + $0x1], 0  ;;  %s819_s24 = smov 0   ;;  %s821_s25 = smov 0  }
   0x2   :  { %s823_s26 = smov 0   ;;  %s825_s27 = smov 0  }
   0x3 LB: > { %s840_s28 = sadd.s32 4294967295, %s773_s27   ;;  %s622_s29 = sadd.s32 4294967294, %s773_s27   ;;  %s773_s27 = sphi %s825_s27, %s1004_s27   ;;  %s769_s26 = sphi %s823_s26, %s1003_s26   ;;  %s765_s25 = sphi %s821_s25, %s1002_s25   ;;  %s761_s24 = sphi %s819_s24, %s1001_s24  }
   0x4   : > { %s844_s30 = sadd.s32 1, %s773_s27   ;;  %s179_s8 = sadd.s32 1, %s769_s26 }
   0x5   : > { %s176_s9 = ssub.s32 %s773_s27, %s844_s30  ;;  %p189_p0 = scmp.ne.s32.totalorder %s769_s26, %s765_s25 }
   0x6   : > { %p177_p1 = scmp.eq.s32.totalorder %s176_s9, 0  ;;  %p190_p2 = scmp.eq.s32.totalorder %s840_s28, 1 }
   0x7   : > { %p195_p3 = scmp.ne.s32.totalorder %s765_s25, %s761_s24  ;;  %p196_p4 = scmp.eq.s32.totalorder %s622_s29, 1 }
   0x8   : > { %s855_s10 = scalar_select %p177_p1, %s769_s26, %s179_s8  }
   0x9   : > { %p857_p5 = por %p190_p2, %p189_p0  ;;  %p861_p6 = por %p196_p4, %p195_p3 }
   0xa   : > { %p625_p7 = scmp.ge.s32.totalorder %s773_s27, 1  ;;  %p239_p8 = scmp.lt.s32.totalorder %s773_s27, 3 }
   0xc   : > { %p240_p9 = pnand %p625_p7, %p239_p8 }
   0xd   : > { %p270_p10 = scmp.lt.s32.totalorder (!%p240_p9), %s840_s28, 1  ;;  %s776_s20 = smov (!%p240_p9), 16  }
   0xe   : > { %243 = sbr.rel (%p240_p9) target bundleno = 834 (0x342), region = 48  ;;  %s778_s22 = smov (!%p240_p9), 113  }
   0xf   : > { %s267_s15 = sand.u32 (!%p240_p9), 1, %s765_s25   ;;  %s731_s14 = scalar_lea.hbm (!%p240_p9), %s998_s7, 16 }
  0x10   : > { %s626_s16 = sshll.u32 (!%p240_p9), %s267_s15, 3  ;;  %s548_s29 = scalar_lea.sflag (!%p240_p9), [#allocation4], %s267_s15 }
  0x13   : > { %v280_v0 = vld [vmem:[%s993_s2 + $0x8] sm:$0xff]  ;;  %v775_v1 = vmov 0   ;;  %v282_v2 = vld [vmem:[%s993_s2 + $0x18] sm:$0xff]  ;;  %s271_s17 = scalar_select %p270_p10, %s840_s28, 1  ;;  %v275_v3 = vld [vmem:[%s992_s1] sm:$0xff]  ;;  %vm303_vm0 = vcmask 64512   ;;  %v349_v45 = vlaneseq }
  0x14   : > { %709 = vset.pattern.permute.xlu1 %v775_v1  ;;  %708 = vset.pattern.permute.xlu0 %v775_v1  ;;  %v279_v5 = vld [vmem:[%s993_s2] sm:$0xff]  ;;  %v281_v6 = vld [vmem:[%s993_s2 + $0x10] sm:$0xff]  ;;  %v276_v7 = vld [vmem:[%s992_s1 + $0x8] sm:$0xff]  ;;  %vm414_vm1 = vcmask 130048   ;;  %vm352_vm2 = vcmask 1047680   ;;  %vm467_vm5 = vcmask 785408  }
  0x15   : > { %290 = vperm.xlu1 %709, %v280_v0   ;;  %300 = vperm.xlu0 %708, %v282_v2   ;;  %s627_s18 = sshll.u32 %s271_s17, 3  ;;  %v277_v8 = vld [vmem:[%s992_s1 + $0x10] sm:$0xff]  ;;  %v278_v9 = vld [vmem:[%s992_s1 + $0x18] sm:$0xff]  ;;  %v514_v43 = vld [vmem:[%s997_s6] sm:$0xff]  ;;  %v350_v46 = vand.u32 127, %v349_v45  ;;  %vm520_vm6 = vcmask 261120  }
  0x16   : > { %710 = vset.pattern.permute.xlu2 %v775_v1  ;;  %s273_s21 = scalar_lea.vmem %s991_s0, %s627_s18  ;;  %v445_v42 = vld [vmem:[%s995_s4 + $0x10] sm:$0xff]  ;;  %v444_v44 = vld [vmem:[%s995_s4 + $0x8] sm:$0xff]  ;;  %v446_v62 = vld [vmem:[%s995_s4 + $0x18] sm:$0xff]  ;;  %s638_s17 = sshll.u32 %s840_s28, 3 }
  0x17   : > { %v881_v4 = vld [vmem:[%s273_s21] sm:$0xff]  ;;  %s777_s21 = smov 127   ;;  %vm397_vm3 = vcmp.eq.s32.totalorder %v350_v46, 15  ;;  %vm351_vm4 = vcmp.eq.s32.totalorder %v350_v46, 0 }
  0x18   : > { %331 = vmatpush.msra.mxu0 %v881_v4  ;;  %v443_v2 = vld [vmem:[%s995_s4] sm:$0xff] }
  0x19   : > { %628 = vmatmul.msk.f32.vlgmr.msra.gmra.mxu0 %vm303_vm0, %v275_v3 }
  0x1d   : > { %285 = vperm.xlu1 %709, %v279_v5   ;;  %295 = vperm.xlu0 %708, %v281_v6  }
  0x21   : > { %629 = vmatmul.msk.f32.gmra.mxu0 %vm303_vm0, %v276_v7 }
  0x29   : > { %630 = vmatmul.msk.f32.gmra.mxu0 %vm303_vm0, %v277_v8 }
  0x31   : > { %631 = vmatmul.msk.f32.gmra.mxu0 %vm303_vm0, %v278_v9 }
  0x87   : > { %v291_v10 = vpop.permute.xlu1 %290  ;;  %v301_v15 = vpop.permute.xlu0 %300 }
  0x8f   : > { %v286_v11 = vpop.permute.xlu1 %285  ;;  %v296_v19 = vpop.permute.xlu0 %295 }
  0x96   : > { %v333_v12 = vpop.f32.mrf.mxu0 }
  0x97   : > { %v334_v13 = vadd.f32 %v333_v12, %v286_v11 }
  0x99   : > { %v345_v14 = vmax.f32 %v334_v13, 0.0  ;;  %v428_v13 = vld [vmem:[%s994_s3 + $0x8] sm:$0xff] }
  0x9b   : > { %419 = vst.msk [vmem:[#allocation2 + $0x20] sm:$0xff] %vm414_vm1, %v345_v14  ;;  %353 = vrot.lane.b32.xlu1 %v345_v14, %s776_s20 }
  0x9e   : > { %v336_v16 = vpop.f32.mrf.mxu0 }
  0x9f   : > { %v337_v17 = vadd.f32 %v336_v16, %v291_v10  ;;  %v427_v16 = vld [vmem:[%s994_s3] sm:$0xff] }
  0xa1   : > { %v346_v18 = vmax.f32 %v337_v17, 0.0  ;;  %v430_v17 = vld [vmem:[%s994_s3 + $0x18] sm:$0xff] }
  0xa2   : > { %v435_v9 = vld [vmem:[#allocation2 + $0x20] sm:$0xff] }
  0xa3   : > { %420 = vst.msk [vmem:[#allocation2 + $0x28] sm:$0xff] %vm414_vm1, %v346_v18  ;;  %356 = vrot.lane.b32.xlu0 %v346_v18, %s776_s20 }
  0xa6   : > { %v339_v20 = vpop.f32.mrf.mxu0 }
  0xa7   : > { %v340_v21 = vadd.f32 %v339_v20, %v296_v19 }
  0xa9   : > { %v347_v22 = vmax.f32 %v340_v21, 0.0 }
  0xaa   : > { %v436_v8 = vld [vmem:[#allocation2 + $0x28] sm:$0xff] }
  0xab   : > { %421 = vst.msk [vmem:[#allocation2 + $0x30] sm:$0xff] %vm414_vm1, %v347_v22 }
  0xae   : > { %v342_v23 = vpop.f32.mrf.mxu0 }
  0xaf   : > { %v343_v24 = vadd.f32 %v342_v23, %v301_v15  ;;  %v429_v15 = vld [vmem:[%s994_s3 + $0x10] sm:$0xff] }
  0xb1   : > { %v348_v25 = vmax.f32 %v343_v24, 0.0 }
  0xb2   : > { %v437_v7 = vld [vmem:[#allocation2 + $0x30] sm:$0xff] }
  0xb3   : > { %422 = vst.msk [vmem:[#allocation2 + $0x38] sm:$0xff] %vm414_vm1, %v348_v25  ;;  %362 = vrot.lane.b32.xlu2 %v348_v25, %s776_s20 }
  0xba   : > { %v438_v3 = vld [vmem:[#allocation2 + $0x38] sm:$0xff] }
  0xbb   : > { %359 = vrot.lane.b32.xlu2 %v347_v22, %s776_s20 }
 0x10d   : > { %v363_v26 = vpop.permute.xlu2 %362  ;;  %v354_v28 = vpop.permute.xlu1 %353 }
 0x10e   : > { %v364_v27 = vsel %vm352_vm2, %v363_v26, %v348_v25  ;;  %v355_v33 = vsel %vm352_vm2, %v354_v28, %v345_v14 }
 0x10f   : > { %371 = vrot.lane.b32.xlu2 %v364_v27, %s776_s20 }
 0x115   : > { %v360_v29 = vpop.permute.xlu2 %359  ;;  %v357_v30 = vpop.permute.xlu0 %356 }
 0x116   : > { %v361_v31 = vsel %vm352_vm2, %v360_v29, %v347_v22  ;;  %v358_v32 = vsel %vm352_vm2, %v357_v30, %v346_v18 }
 0x117   : > { %369 = vrot.lane.b32.xlu0 %v361_v31, %s776_s20  ;;  %367 = vrot.lane.b32.xlu1 %v358_v32, %s776_s20 }
 0x118   : > { %365 = vrot.lane.b32.xlu2 %v355_v33, %s776_s20  ;;  %s558_s20 = scalar_lea.hbm %s998_s7, %s638_s17 }
 0x119   : > { %s562_s23 = sshll.u32 %s558_s20, 4  ;;  %s563_s23 = int_to_ptr.hbm [resolvable:$true] %s562_s23 }
 0x11a   : > { %s725_s28 = sshra.s32 %s563_s23, 4  ;;  %s726_s28 = int_to_ptr.hbm [resolvable:$true] %s725_s28 }
 0x11b   : > { %s727_s8 = scalar_lea.hbm %s726_s28, 8  ;;  %p732_p0 = scmp.lt.s32.totalorder %s726_s28, %s998_s7 }
 0x11c   : > { %p728_p11 = scmp.ne.s32.totalorder %s726_s28, %s727_s8  ;;  %p733_p1 = scmp.lt.s32.totalorder %s731_s14, %s727_s8 }
 0x11e   : > { %p729_p12 = pnand %p728_p11, %p857_p5  ;;  %p734_p2 = por %p733_p1, %p732_p0 }
 0x120   : > { %p730_p13 = pneg %p729_p12 }
 0x122   : > { %p735_p3 = pnand %p734_p2, %p730_p13 }
 0x169   : > { %v372_v34 = vpop.permute.xlu2 %371 }
 0x16a   : > { %v376_v35 = vsel %vm352_vm2, %v372_v34, %v348_v25  ;;  %v513_v34 = vld [vmem:[%s996_s5] sm:$0xff] }
 0x16b   : > { %404 = vrot.lane.b32.xlu0 %v376_v35, %s777_s21 }
 0x172   : > { %v366_v36 = vpop.permute.xlu2 %365 }
 0x173   : > { %v373_v37 = vsel %vm352_vm2, %v366_v36, %v345_v14 }
 0x174   : > { %398 = vrot.lane.b32.xlu0 %v373_v37, %s777_s21 }
 0x189   : > { %v370_v38 = vpop.permute.xlu0 %369  ;;  %v368_v39 = vpop.permute.xlu1 %367 }
 0x18a   : > { %v375_v40 = vsel %vm352_vm2, %v370_v38, %v347_v22  ;;  %v374_v41 = vsel %vm352_vm2, %v368_v39, %v346_v18 }
 0x18b   : > { %402 = vrot.lane.b32.xlu1 %v375_v40, %s777_s21  ;;  %383 = vrot.lane.b32.xlu0 %v374_v41, %s778_s22 }
 0x18c   : > { %400 = vrot.lane.b32.xlu2 %v374_v41, %s777_s21  ;;  %s269_s21 = scalar_lea.vmem [#allocation3], %s626_s16 }
 0x193   : > { %387 = vrot.lane.b32.xlu1 %v376_v35, %s778_s22  ;;  %459 = vperm.xlu0 %708, %v445_v42  }
 0x194   : > { %385 = vrot.lane.b32.xlu2 %v375_v40, %s778_s22 }
 0x19b   : > { %381 = vrot.lane.b32.xlu1 %v373_v37, %s778_s22  ;;  %517 = vperm.xlu0 %708, %v514_v43   ;;  %s560_s22 = sshll.u32 %s269_s21, 4  ;;  %s561_s22 = int_to_ptr.vmem [resolvable:$true] %s560_s22 }
 0x19c   : > { %464 = vperm.xlu2 %710, %v446_v62  }
 0x1a3   : > { %454 = vperm.xlu1 %709, %v444_v44  }
 0x1a4   : > { %449 = vperm.xlu2 %710, %v443_v2  }
 0x1dd   : > { %v405_v47 = vpop.permute.xlu0 %404 }
 0x1de   : > { %v413_v48 = vsel %vm397_vm3, 0.0, %v405_v47 }
 0x1df   : > { %426 = vst.msk [vmem:[#allocation2 + $0x58] sm:$0xff] %vm414_vm1, %v413_v48 }
 0x1e6   : > { %v399_v49 = vpop.permute.xlu0 %398  ;;  %v401_v50 = vpop.permute.xlu2 %400  ;;  %v442_v51 = vld [vmem:[#allocation2 + $0x58] sm:$0xff] }
 0x1e7   : > { %v410_v52 = vsel %vm397_vm3, 0.0, %v399_v49  ;;  %v411_v53 = vsel %vm397_vm3, 0.0, %v401_v50  ;;  %484 = vmatpush.msra.mxu1 %v442_v51  ;;  %641 = vmatpush.msra.mxu2 %v442_v51 }
 0x1e8   : > { %423 = vst.msk [vmem:[#allocation2 + $0x40] sm:$0xff] %vm414_vm1, %v410_v52  ;;  %642 = vmatpush.msra.mxu3 %v442_v51 }
 0x1e9   : > { %424 = vst.msk [vmem:[#allocation2 + $0x48] sm:$0xff] %vm414_vm1, %v411_v53 }
 0x1ee   : > { %v386_v54 = vpop.permute.xlu2 %385 }
 0x1ef   : > { %v395_v55 = vsel %vm351_vm4, 0.0, %v386_v54  ;;  %v439_v1 = vld [vmem:[#allocation2 + $0x40] sm:$0xff] }
 0x1f0   : > { %417 = vst.msk [vmem:[#allocation2 + $0x10] sm:$0xff] %vm414_vm1, %v395_v55  ;;  %v440_v0 = vld [vmem:[#allocation2 + $0x48] sm:$0xff] }
 0x1f6   : > { %v465_v18 = vpop.permute.xlu2 %464 }
 0x1f7   : > { %v433_v11 = vld [vmem:[#allocation2 + $0x10] sm:$0xff] }
 0x1fd   : > { %v384_v56 = vpop.permute.xlu0 %383  ;;  %v403_v57 = vpop.permute.xlu1 %402 }
 0x1fe   : > { %v394_v58 = vsel %vm351_vm4, 0.0, %v384_v56  ;;  %v412_v59 = vsel %vm397_vm3, 0.0, %v403_v57  ;;  %v450_v26 = vpop.permute.xlu2 %449 }
 0x1ff   : > { %416 = vst.msk [vmem:[#allocation2 + $0x8] sm:$0xff] %vm414_vm1, %v394_v58 }
 0x200   : > { %425 = vst.msk [vmem:[#allocation2 + $0x50] sm:$0xff] %vm414_vm1, %v412_v59 }
 0x205   : > { %v388_v60 = vpop.permute.xlu1 %387  ;;  %v460_v20 = vpop.permute.xlu0 %459 }
 0x206   : > { %v396_v61 = vsel %vm351_vm4, 0.0, %v388_v60  ;;  %v432_v12 = vld [vmem:[#allocation2 + $0x8] sm:$0xff] }
 0x207   : > { %418 = vst.msk [vmem:[#allocation2 + $0x18] sm:$0xff] %vm414_vm1, %v396_v61  ;;  %v441_v63 = vld [vmem:[#allocation2 + $0x50] sm:$0xff] }
 0x208   : > { %485 = vmatpush.msra.mxu1 %v441_v63  ;;  %643 = vmatpush.msra.mxu2 %v441_v63 }
 0x209   : > { %644 = vmatpush.msra.mxu3 %v441_v63 }
 0x20a   : > { %486 = vmatpush.msra.mxu1 %v440_v0  ;;  %645 = vmatpush.msra.mxu2 %v440_v0 }
 0x20b   : > { %646 = vmatpush.msra.mxu3 %v440_v0 }
 0x20c   : > { %487 = vmatpush.msra.mxu1 %v439_v1  ;;  %647 = vmatpush.msra.mxu2 %v439_v1 }
 0x20d   : > { %648 = vmatpush.msra.mxu3 %v439_v1  ;;  %v382_v5 = vpop.permute.xlu1 %381  ;;  %v518_v35 = vpop.permute.xlu0 %517 }
 0x20e   : > { %488 = vmatpush.msra.mxu1 %v438_v3  ;;  %649 = vmatpush.msra.mxu2 %v438_v3  ;;  %v393_v6 = vsel %vm351_vm4, 0.0, %v382_v5  ;;  %v434_v10 = vld [vmem:[#allocation2 + $0x18] sm:$0xff] }
 0x20f   : > { %650 = vmatpush.msra.mxu3 %v438_v3  ;;  %415 = vst.msk [vmem:[#allocation2] sm:$0xff] %vm414_vm1, %v393_v6 }
 0x210   : > { %489 = vmatpush.msra.mxu1 %v437_v7  ;;  %651 = vmatpush.msra.mxu2 %v437_v7 }
 0x211   : > { %652 = vmatpush.msra.mxu3 %v437_v7 }
 0x212   : > { %490 = vmatpush.msra.mxu1 %v436_v8  ;;  %653 = vmatpush.msra.mxu2 %v436_v8 }
 0x213   : > { %654 = vmatpush.msra.mxu3 %v436_v8 }
 0x214   : > { %491 = vmatpush.msra.mxu1 %v435_v9  ;;  %655 = vmatpush.msra.mxu2 %v435_v9 }
 0x215   : > { %656 = vmatpush.msra.mxu3 %v435_v9  ;;  %v455_v23 = vpop.permute.xlu1 %454 }
 0x216   : > { %492 = vmatpush.msra.mxu1 %v434_v10  ;;  %657 = vmatpush.msra.mxu2 %v434_v10  ;;  %v431_v14 = vld [vmem:[#allocation2] sm:$0xff] }
 0x217   : > { %658 = vmatpush.msra.mxu3 %v434_v10 }
 0x218   : > { %493 = vmatpush.msra.mxu1 %v433_v11  ;;  %659 = vmatpush.msra.mxu2 %v433_v11 }
 0x219   : > { %660 = vmatpush.msra.mxu3 %v433_v11 }
 0x21a   : > { %494 = vmatpush.msra.mxu1 %v432_v12  ;;  %661 = vmatpush.msra.mxu2 %v432_v12 }
 0x21b   : > { %662 = vmatpush.msra.mxu3 %v432_v12 }
 0x21c   : > { %495 = vmatpush.msra.mxu1 %v431_v14  ;;  %663 = vmatpush.msra.mxu2 %v431_v14 }
 0x21d   : > { %664 = vmatpush.msra.mxu3 %v431_v14  ;;  %633 = vmatmul.msk.f32.vlgmr.msra.gmra.mxu2 %vm467_vm5, %v428_v13 }
 0x21e   : > { %634 = vmatmul.msk.f32.vlgmr.msra.gmra.mxu3 %vm467_vm5, %v429_v15  ;;  %632 = vmatmul.msk.f32.vlgmr.msra.gmra.mxu1 %vm467_vm5, %v427_v16 }
 0x226   : > { %635 = vmatmul.msk.f32.gmra.mxu3 %vm467_vm5, %v430_v17 }
 0x29b   : > { %v497_v27 = vpop.f32.mrf.mxu1 }
 0x29c   : > { %v498_v31 = vadd.f32 %v497_v27, %v450_v26 }
 0x29e   : > { %v509_v33 = vmax.f32 %v498_v31, 0.0 }
 0x2a0   : > { %v500_v21 = vpop.f32.mrf.mxu2 }
 0x2a1   : > { %v503_v19 = vpop.f32.mrf.mxu3  ;;  %v501_v28 = vadd.f32 %v500_v21, %v455_v23 }
 0x2a2   : > { %v504_v24 = vadd.f32 %v503_v19, %v460_v20 }
 0x2a3   : > { %v510_v32 = vmax.f32 %v501_v28, 0.0 }
 0x2a4   : > { %v511_v30 = vmax.f32 %v504_v24, 0.0 }
 0x2a9   : > { %v506_v22 = vpop.f32.mrf.mxu3 }
 0x2aa   : > { %v507_v25 = vadd.f32 %v506_v22, %v465_v18 }
 0x2ac   : > { %v512_v29 = vmax.f32 %v507_v25, 0.0 }
 0x2ae   : > { %536 = vmatpush.msrb.mxu2 %v512_v29 }
 0x2b0   : > { %537 = vmatpush.msrb.mxu2 %v511_v30 }
 0x2b2   : > { %538 = vmatpush.msrb.mxu2 %v510_v32 }
 0x2b4   : > { %539 = vmatpush.msrb.mxu2 %v509_v33 }
 0x2b5   : > { %636 = vmatmul.msk.f32.vlgmr.msrb.gmra.mxu2 %vm520_vm6, %v513_v34 }
 0x338   : > { %v541_v36 = vpop.f32.mrf.mxu2 }
 0x339   : > { %v542_v37 = vadd.f32 %v541_v36, %v518_v35 }
 0x33b   : > { %v544_v38 = vadd.f32 %v542_v37, %v881_v4 }
 0x33d   : > { %v545_v39 = vmax.f32 %v544_v38, 0.0 }
 0x33f   : > { %546 = vst.msk [vmem:[%s269_s21] sm:$0xff] %vm414_vm1, %v545_v39 }
 0x340   : > { %738 = shalt.err (!%p735_p3)
}
 0x341   : > { %665 = dma.vmem_to_hbm [thread:$0]  (%p857_p5), %s561_s22, 128, %s563_s23, %s548_s29  }
 0x342 PF: > { %p671_p4 = scmp.ge.s32.totalorder %s773_s27, 2  ;;  %s574_s15 = sand.u32 1, %s761_s24  }
 0x343   : > { %s575_s18 = scalar_lea.sflag [#allocation4], %s574_s15 }
 0x344   : > { %p668_p7 = pnand %p671_p4, %p861_p6 }
 0x346   : > { %p669_p8 = pneg %p668_p7 }
 0x348   : > { %756 = dma.done.wait (%p669_p8), %s575_s18, 128  }
 0x349   : > { %758 = vsyncadd (%p669_p8), %s575_s18, 4294967168  ;;  %p17_p9 = scmp.ge.s32.totalorder %s844_s30, 4   ;;  %s1001_s24 = smov %s765_s25 }
 0x34a   : > { %s1002_s25 = smov %s769_s26  ;;  %s1003_s26 = smov %s855_s10 }
 0x34b   : > { %s1004_s27 = smov %s844_s30  ;;  %19 = sbr.rel (!%p17_p9) target bundleno = 3 (0x3), region = 83 }
 0x350   :  { %581 = vsyncpa [#allocation4], 1 }
 0x351   :  { %583 = vsyncpa [#allocation4 + $0x1], 1 }

</bundles_post_ra>
